<compile_context>
chip_gen: v7x
topology: tpu7x:2x2x1
jax: 0.10.0
libtpu: 0.0.40
codegen_flags: <defaults>
</compile_context>

<pallas_src>
import functools

import jax
import jax.numpy as jnp
from jax import lax
from jax.experimental import pallas as pl
from jax.experimental.pallas import tpu as pltpu

LANES = 128
SUBLANES = 8


# ----------------------------------------------------------------------------
# Hardware probe (conservative): 2 TensorCores only on v7x, else 1.
# ----------------------------------------------------------------------------
@functools.lru_cache(maxsize=None)
def _tensorcore_info():
    kind = ""
    try:
        kind = (getattr(jax.devices()[0], "device_kind", "") or "")
    except Exception:
        pass
    norm = kind.replace(" ", "").lower()
    is_v7x = ("v7" in norm) or ("tpu7" in norm)
    return (2 if is_v7x else 1), is_v7x


# ----------------------------------------------------------------------------
# Fused kernel: streaming MSE reduction + fc/label losses in the epilogue.
# Output block per parallel part: (1, 8, 128) f32 where
#   [0, 0, 0] = partial sum of squared diffs for this part
#   [0, 0, 1] = bce mean, [0, 0, 2] = accuracy, [0, 0, 3] = soft-F1 loss
# ----------------------------------------------------------------------------
def _fused_loss_kernel(fc_ref, label_ref, a_ref, b_ref, out_ref, acc_ref, *,
                       rows, tile_rows, total_blocks, blocks_per_part,
                       need_mask):
    p = pl.program_id(0)          # parallel part (megacore split on 2-TC chips)
    i = pl.program_id(1)          # reduction step within the part

    @pl.when(i == 0)
    def _init():
        acc_ref[...] = jnp.zeros_like(acc_ref)

    # Streaming squared-difference: purely elementwise (VPU only).
    d = a_ref[...].astype(jnp.float32) - b_ref[...].astype(jnp.float32)
    dd = d * d

    def _accumulate(vals):
        # (tile_rows, 128) -> (tile_rows//8, 8, 128): trailing (8, 128) vreg
        # tile is unchanged (layout-preserving), so this lowers to plain VALU
        # vreg adds into the single-vreg accumulator — no full-tile VMEM
        # read-modify-write per step.
        acc_ref[...] += vals.reshape(tile_rows // SUBLANES, SUBLANES,
                                     LANES).sum(axis=0)

    if need_mask:
        g = p * blocks_per_part + i          # global block index (unclamped)

        @pl.when(g >= total_blocks - 1)
        def _edge_or_duplicate():
            # Partial edge block and/or clamped duplicate block from the
            # parallel split: zero out rows beyond the real data.  Keep the
            # select (jnp.where) form — padded rows may hold garbage.
            row_idx = g * tile_rows + lax.broadcasted_iota(jnp.int32,
                                                           dd.shape, 0)
            _accumulate(jnp.where(row_idx < rows, dd, 0.0))

        @pl.when(g < total_blocks - 1)
        def _interior():
            _accumulate(dd)
    else:
        _accumulate(dd)

    @pl.when(i == pl.num_programs(1) - 1)
    def _epilogue():
        # Partial sum of squared differences for this part: one vreg reduce.
        sq = jnp.sum(acc_ref[...])

        # fc / label losses.  fc & label are tiny; recomputing them on every
        # part avoids any cross-part sync and hides under the last tile's DMA.
        x = fc_ref[...].astype(jnp.float32)       # logits  (B, C)
        y = label_ref[...].astype(jnp.float32)    # targets (B, C) in [0, 1]

        # Share one transcendental: e = exp(-|x|) feeds both BCE and sigmoid.
        e = jnp.exp(-jnp.abs(x))
        # BCEWithLogitsLoss (mean): max(x,0) - x*y + log(1 + exp(-|x|))
        bce = jnp.mean(jnp.maximum(x, 0.0) - x * y + jnp.log1p(e))

        # Accuracy: mean over ((fc > 0) == (label > 0.5))
        agree = jnp.logical_not(jnp.logical_xor(x > 0.0, y > 0.5))
        acc_m = jnp.mean(agree.astype(jnp.float32))

        # Sigmoid derived from the shared exp (exact, no extra transcendental).
        inv = 1.0 / (1.0 + e)
        prob = jnp.where(x >= 0.0, inv, e * inv)

        # Soft (macro) F1 loss.
        # TODO(synk): F1Loss source was not provided; standard per-class
        #             soft-F1 (batch sums, macro average, eps=1e-8) assumed.
        tp = jnp.sum(prob * y, axis=0)
        fp = jnp.sum(prob * (1.0 - y), axis=0)
        fn = jnp.sum((1.0 - prob) * y, axis=0)
        f1 = (2.0 * tp) / (2.0 * tp + fp + fn + 1e-8)
        f1_loss = 1.0 - jnp.mean(f1)

        lane = lax.broadcasted_iota(jnp.int32, out_ref.shape, 2)
        sub = lax.broadcasted_iota(jnp.int32, out_ref.shape, 1)

        def put(k, v):
            return jnp.where((sub == 0) & (lane == k), v, 0.0)

        out_ref[...] = put(0, sq) + put(1, bce) + put(2, acc_m) + put(3, f1_loss)


def fused_losses(fc, label, unet, img, *, max_tile_rows=4096, num_parts=None,
                 img_buffers=None):
    """Returns (bce, acc, f1_loss, mse) from one fused Pallas kernel."""
    n = unet.size
    a_flat = unet.reshape(-1)     # bitcast reshape, no HBM copy, original dtype
    b_flat = img.reshape(-1)

    tail = None
    if n < SUBLANES * LANES:
        # Degenerate tiny input: pad (f32) up to a single (8, 128) block.
        # Padded zeros in both operands contribute nothing to the sum.
        pad = SUBLANES * LANES - n
        a_main = jnp.concatenate(
            [a_flat.astype(jnp.float32), jnp.zeros((pad,), jnp.float32)]
        ).reshape(SUBLANES, LANES)
        b_main = jnp.concatenate(
            [b_flat.astype(jnp.float32), jnp.zeros((pad,), jnp.float32)]
        ).reshape(SUBLANES, LANES)
        rows = SUBLANES
    else:
        n_main = (n // LANES) * LANES
        rows = n_main // LANES            # >= 8 here
        if n_main == n:
            a_main = a_flat.reshape(rows, LANES)   # pure reshape, no copy
            b_main = b_flat.reshape(rows, LANES)
        else:
            # Rare: element count not a multiple of 128.  Main part streams
            # through the kernel; the <128-element tail is summed in plain JAX.
            a_main = a_flat[:n_main].reshape(rows, LANES)
            b_main = b_flat[:n_main].reshape(rows, LANES)
            tail = (a_flat[n_main:], b_flat[n_main:])

    # Tile sizing: ~2 MiB f32 blocks (above the measured HBM-streaming knee,
    # amortizes the ~0.35 us per-grid-step overhead); always a multiple of 8
    # sublanes so the single-vreg accumulator reshape is layout-preserving.
    if rows >= max_tile_rows:
        tile_rows = max_tile_rows
    else:
        tile_rows = (rows // SUBLANES) * SUBLANES
    total_blocks = -(-rows // tile_rows)

    # Parallel split across TensorCores only where it helps (v7x has 2 TCs per
    # chip).  On single-TC v5e/v6e the split is pure overhead: per-step
    # masking plus a wasted duplicate-block fetch when total_blocks is odd.
    auto_tc, is_v7x = _tensorcore_info()
    if num_parts is None:
        num_parts = auto_tc
    num_parts = max(1, min(int(num_parts), total_blocks))
    blocks_per_part = -(-total_blocks // num_parts)
    need_mask = (rows % tile_rows != 0) or (num_parts * blocks_per_part
                                            != total_blocks)

    # Triple-buffer the image streams on v7x only (higher HBM BW makes
    # step-boundary bubbles visible there); 2 buffers elsewhere.
    if img_buffers is None:
        img_buffers = 3 if (is_v7x and blocks_per_part >= 3) else 2

    B, C = fc.shape
    # TODO(synk): if fc/label ever scale to thousands of rows, tile them over B
    #             instead of whole-array resident blocks.

    def img_index_map(p_, i_):
        # Clamp so padded grid steps of the parallel split re-fetch the last
        # valid block (their contribution is masked to zero in-kernel).
        return (jnp.minimum(p_ * blocks_per_part + i_, total_blocks - 1), 0)

    if img_buffers != 2:
        img_spec = pl.BlockSpec((tile_rows, LANES), img_index_map,
                                pipeline_mode=pl.Buffered(img_buffers))
    else:
        img_spec = pl.BlockSpec((tile_rows, LANES), img_index_map)

    kernel = functools.partial(
        _fused_loss_kernel, rows=rows, tile_rows=tile_rows,
        total_blocks=total_blocks, blocks_per_part=blocks_per_part,
        need_mask=need_mask)

    # Explicit scoped-VMEM limit sized for the chosen tile / buffer count
    # (v5e defaults to 16 MiB scoped; keep well under v7x's 64 MiB physical).
    tile_bytes = tile_rows * LANES * 4
    small_bytes = (4 * fc.size * fc.dtype.itemsize
                   + 4 * label.size * label.dtype.itemsize
                   + 2 * num_parts * SUBLANES * LANES * 4
                   + SUBLANES * LANES * 4)
    vmem_limit = 2 * img_buffers * tile_bytes + small_bytes + (6 << 20)
    vmem_limit = int(min(max(vmem_limit, 16 << 20), 30 << 20))

    # Advisory cost estimate: two f32 streams dominate (memory-bound call).
    n_kernel = rows * LANES
    cost = pl.CostEstimate(
        flops=int(3 * n_kernel + 16 * fc.size),
        transcendentals=int(2 * fc.size * num_parts),
        bytes_accessed=int(a_main.size * a_main.dtype.itemsize
                           + b_main.size * b_main.dtype.itemsize
                           + fc.size * fc.dtype.itemsize
                           + label.size * label.dtype.itemsize
                           + num_parts * SUBLANES * LANES * 4),
    )

    out = pl.pallas_call(
        kernel,
        out_shape=jax.ShapeDtypeStruct((num_parts, SUBLANES, LANES),
                                       jnp.float32),
        grid=(num_parts, blocks_per_part),
        in_specs=[
            pl.BlockSpec((B, C), lambda p_, i_: (0, 0)),   # fc (resident)
            pl.BlockSpec((B, C), lambda p_, i_: (0, 0)),   # label (resident)
            img_spec,                                      # unet tiles
            img_spec,                                      # img tiles
        ],
        out_specs=pl.BlockSpec((1, SUBLANES, LANES), lambda p_, i_: (p_, 0, 0)),
        scratch_shapes=[pltpu.VMEM((SUBLANES, LANES), jnp.float32)],
        compiler_params=pltpu.CompilerParams(
            dimension_semantics=("parallel", "arbitrary"),
            vmem_limit_bytes=vmem_limit),
        cost_estimate=cost,
    )(fc, label, a_main, b_main)

    sq_sum = jnp.sum(out[:, 0, 0])
    if tail is not None:
        ta, tb = tail
        sq_sum = sq_sum + jnp.sum(
            (ta.astype(jnp.float32) - tb.astype(jnp.float32)) ** 2)
    mse = sq_sum / jnp.float32(n)

    bce = out[0, 0, 1]
    acc = out[0, 0, 2]
    f1_loss = out[0, 0, 3]
    return bce, acc, f1_loss, mse


# ----------------------------------------------------------------------------
# Loss_v7 forward (glue)
# ----------------------------------------------------------------------------
DEFAULT_CONFIG_LOSS = {
    "weight_bce": 1.0,
    "weight_f1": 0.5,
    "weight_mse": 1.0,
    "stage_epoch": [0, 2],
}


def loss_v7_forward(results, batch, epoch, config_loss=DEFAULT_CONFIG_LOSS):
    fc = results["fc"]
    label = batch["label"]
    unet = results["unet"]
    img = batch["img"]

    bce, acc, f1_loss, mse = fused_losses(fc, label, unet, img)

    loss_dict = {
        "bce": bce,
        "mse": mse,
        "f1_score_label": label > 0.5,   # bool map (glue, elementwise)
        "f1_score_pred": fc > 0.0,       # bool map (glue, elementwise)
        "acc": acc,
    }

    if epoch >= config_loss["stage_epoch"][1]:
        loss_dict["f1_loss"] = f1_loss
        loss_dict["total"] = (config_loss["weight_bce"] * bce
                              + config_loss["weight_f1"] * f1_loss
                              + mse)
    else:
        loss_dict["total"] = (config_loss["weight_bce"] * bce
                              + config_loss["weight_mse"] * mse)
    return loss_dict


# ----------------------------------------------------------------------------
# Pure-JAX reference for sanity checks
# ----------------------------------------------------------------------------
def _ref_losses(fc, label, unet, img):
    x = fc.astype(jnp.float32)
    y = label.astype(jnp.float32)
    bce = jnp.mean(jnp.maximum(x, 0.0) - x * y + jnp.log1p(jnp.exp(-jnp.abs(x))))
    acc = jnp.mean(((x > 0.0) == (y > 0.5)).astype(jnp.float32))
    p = jax.nn.sigmoid(x)
    tp = jnp.sum(p * y, axis=0)
    fp = jnp.sum(p * (1.0 - y), axis=0)
    fn = jnp.sum((1.0 - p) * y, axis=0)
    f1 = 2.0 * tp / (2.0 * tp + fp + fn + 1e-8)
    f1_loss = 1.0 - jnp.mean(f1)
    mse = jnp.mean((unet.astype(jnp.float32) - img.astype(jnp.float32)) ** 2)
    return bce, acc, f1_loss, mse


def _reference(results, batch, epoch, config_loss=DEFAULT_CONFIG_LOSS):
    bce, acc, f1_loss, mse = _ref_losses(results["fc"], batch["label"],
                                         results["unet"], batch["img"])
    if epoch >= config_loss["stage_epoch"][1]:
        total = (config_loss["weight_bce"] * bce
                 + config_loss["weight_f1"] * f1_loss + mse)
    else:
        total = config_loss["weight_bce"] * bce + config_loss["weight_mse"] * mse
    return dict(bce=bce, mse=mse, acc=acc, f1_loss=f1_loss, total=total)


if __name__ == "__main__":
    key = jax.random.PRNGKey(0)
    k1, k2, k3, k4, k5, k6, k7, k8 = jax.random.split(key, 8)

    B, C_CLS = 8, 8                     # classifier logits / labels
    B_IMG, C_IMG, H, W = 2, 4, 16, 16   # unet reconstruction / image (NCHW)

    results = {
        "fc": jax.random.normal(k1, (B, C_CLS), dtype=jnp.float32),
        "unet": jax.random.normal(k2, (B_IMG, C_IMG, H, W), dtype=jnp.float32),
    }
    batch = {
        "label": (jax.random.uniform(k3, (B, C_CLS)) > 0.5).astype(jnp.float32),
        "img": jax.random.normal(k4, (B_IMG, C_IMG, H, W), dtype=jnp.float32),
    }

    # Stage 2 (epoch >= stage_epoch[1]): bce + soft F1 + mse
    out = loss_v7_forward(results, batch, epoch=3)
    jax.block_until_ready(out["total"])
    ref = _reference(results, batch, 3)
    for name in ("bce", "mse", "acc", "f1_loss", "total"):
        assert jnp.allclose(out[name], ref[name], rtol=1e-5, atol=1e-5), (
            name, out[name], ref[name])

    # Stage 1 path
    out_s1 = loss_v7_forward(results, batch, epoch=0)
    jax.block_until_ready(out_s1["total"])
    ref_s1 = _reference(results, batch, 0)
    assert jnp.allclose(out_s1["total"], ref_s1["total"], rtol=1e-5, atol=1e-5)

    # Larger image through the default path.
    unet_big = jax.random.normal(k5, (3, 4, 100, 128), dtype=jnp.float32)
    img_big = jax.random.normal(k6, (3, 4, 100, 128), dtype=jnp.float32)
    results_big = {"fc": results["fc"], "unet": unet_big}
    batch_big = {"label": batch["label"], "img": img_big}
    out_big = loss_v7_forward(results_big, batch_big, epoch=3)
    jax.block_until_ready(out_big["total"])
    ref_big = _reference(results_big, batch_big, 3)
    for name in ("bce", "mse", "acc", "f1_loss", "total"):
        assert jnp.allclose(out_big[name], ref_big[name], rtol=2e-4, atol=2e-4), (
            name, out_big[name], ref_big[name])

    # Multi-block tiling + partial edge block + forced 2-part parallel split
    # (exercises the clamped-duplicate masking path on any chip generation).
    got = fused_losses(results["fc"], batch["label"], unet_big, img_big,
                       max_tile_rows=64, num_parts=2)
    jax.block_until_ready(got[-1])
    want = _ref_losses(results["fc"], batch["label"], unet_big, img_big)
    for name, g, w in zip(("bce", "acc", "f1_loss", "mse"), got, want):
        assert jnp.allclose(g, w, rtol=2e-4, atol=2e-4), (name, g, w)

    # Element count not a multiple of 128: kernel main part + JAX tail sum,
    # plus a masked partial edge block (rows=9, tile_rows=8).
    unet_odd = jax.random.normal(k7, (1, 1, 9, 130), dtype=jnp.float32)
    img_odd = jax.random.normal(k8, (1, 1, 9, 130), dtype=jnp.float32)
    got = fused_losses(results["fc"], batch["label"], unet_odd, img_odd)
    jax.block_until_ready(got[-1])
    want = _ref_losses(results["fc"], batch["label"], unet_odd, img_odd)
    for name, g, w in zip(("bce", "acc", "f1_loss", "mse"), got, want):
        assert jnp.allclose(g, w, rtol=1e-5, atol=1e-5), (name, g, w)

    print("KERNEL_OK")
</pallas_src>

<mosaic_0001>
module attributes {stable_mosaic.version = 11 : i64} {
  func.func @_fused_loss_kernel(%arg0: i32, %arg1: i32, %arg2: memref<8x8xf32, #tpu.memory_space<vmem>>, %arg3: memref<8x8xf32, #tpu.memory_space<vmem>>, %arg4: memref<16x128xf32, #tpu.memory_space<vmem>>, %arg5: memref<16x128xf32, #tpu.memory_space<vmem>>, %arg6: memref<1x8x128xf32, #tpu.memory_space<vmem>>, %arg7: memref<8x128xf32, #tpu.memory_space<vmem>>) attributes {dimension_semantics = [#tpu.dimension_semantics<parallel>, #tpu.dimension_semantics<arbitrary>], iteration_bounds = array<i64: 1, 1>, scalar_prefetch = 0 : i64, scratch_operands = 1 : i64, tpu.core_type = #tpu.core_type<tc>, window_params = [{pipeline_mode = #tpu.pipeline_mode<synchronous>, transform_indices = @transform_0, window_bounds = array<i64: 8, 8>}, {pipeline_mode = #tpu.pipeline_mode<synchronous>, transform_indices = @transform_1, window_bounds = array<i64: 8, 8>}, {transform_indices = @transform_2, window_bounds = array<i64: 16, 128>}, {transform_indices = @transform_3, window_bounds = array<i64: 16, 128>}, {transform_indices = @transform_4, window_bounds = array<i64: 1, 8, 128>}]} {
    %c0_i32 = arith.constant 0 : i32
    %0 = arith.cmpi eq, %arg1, %c0_i32 : i32
    %1 = arith.extui %0 : i1 to i32
    %c0_i32_0 = arith.constant 0 : i32
    %2 = arith.cmpi ne, %1, %c0_i32_0 : i32
    scf.if %2 {
      %cst_10 = arith.constant 0.000000e+00 : f32
      %15 = vector.broadcast %cst_10 : f32 to vector<8x128xf32>
      %c0_11 = arith.constant 0 : index
      %c0_12 = arith.constant 0 : index
      %16 = vector.load %arg7[%c0_11, %c0_12] : memref<8x128xf32, #tpu.memory_space<vmem>>, vector<8x128xf32>
      tpu.vector_store %arg7[%c0_11, %c0_12], %15 {strides = array<i32>} : memref<8x128xf32, #tpu.memory_space<vmem>>, vector<8x128xf32>,
    } else {
    }
    %c0 = arith.constant 0 : index
    %c0_1 = arith.constant 0 : index
    %3 = vector.load %arg4[%c0, %c0_1] : memref<16x128xf32, #tpu.memory_space<vmem>>, vector<16x128xf32>
    %c0_2 = arith.constant 0 : index
    %c0_3 = arith.constant 0 : index
    %4 = vector.load %arg5[%c0_2, %c0_3] : memref<16x128xf32, #tpu.memory_space<vmem>>, vector<16x128xf32>
    %5 = arith.subf %3, %4 : vector<16x128xf32>
    %6 = arith.mulf %5, %5 : vector<16x128xf32>
    %c0_4 = arith.constant 0 : index
    %c0_5 = arith.constant 0 : index
    %7 = vector.load %arg7[%c0_4, %c0_5] : memref<8x128xf32, #tpu.memory_space<vmem>>, vector<8x128xf32>
    %8 = vector.shape_cast %6 : vector<16x128xf32> to vector<2x8x128xf32>
    %cst = arith.constant dense<0.000000e+00> : vector<8x128xf32>
    %9 = vector.multi_reduction <add>, %8, %cst [0] : vector<2x8x128xf32> to vector<8x128xf32>
    %10 = arith.addf %7, %9 : vector<8x128xf32>
    %c0_6 = arith.constant 0 : index
    %c0_7 = arith.constant 0 : index
    %11 = vector.load %arg7[%c0_6, %c0_7] : memref<8x128xf32, #tpu.memory_space<vmem>>, vector<8x128xf32>
    tpu.vector_store %arg7[%c0_6, %c0_7], %10 {strides = array<i32>} : memref<8x128xf32, #tpu.memory_space<vmem>>, vector<8x128xf32>,
    %c0_i32_8 = arith.constant 0 : i32
    %12 = arith.cmpi eq, %arg1, %c0_i32_8 : i32
    %13 = arith.extui %12 : i1 to i32
    %c0_i32_9 = arith.constant 0 : i32
    %14 = arith.cmpi ne, %13, %c0_i32_9 : i32
    scf.if %14 {
      %c0_10 = arith.constant 0 : index
      %c0_11 = arith.constant 0 : index
      %15 = vector.load %arg7[%c0_10, %c0_11] : memref<8x128xf32, #tpu.memory_space<vmem>>, vector<8x128xf32>
      %16 = vector.shape_cast %15 : vector<8x128xf32> to vector<1x8x128xf32>
      %cst_12 = arith.constant dense<0.000000e+00> : vector<1xf32>
      %17 = vector.multi_reduction <add>, %16, %cst_12 [1, 2] : vector<1x8x128xf32> to vector<1xf32>
      %18 = vector.shape_cast %17 : vector<1xf32> to vector<1x1x1xf32>
      %19 = vector.extract %18[0, 0, 0] : f32 from vector<1x1x1xf32>
      %c0_13 = arith.constant 0 : index
      %c0_14 = arith.constant 0 : index
      %20 = vector.load %arg2[%c0_13, %c0_14] : memref<8x8xf32, #tpu.memory_space<vmem>>, vector<8x8xf32>
      %c0_15 = arith.constant 0 : index
      %c0_16 = arith.constant 0 : index
      %21 = vector.load %arg3[%c0_15, %c0_16] : memref<8x8xf32, #tpu.memory_space<vmem>>, vector<8x8xf32>
      %22 = math.absf %20 : vector<8x8xf32>
      %cst_17 = arith.constant 0.000000e+00 : f32
      %23 = vector.broadcast %cst_17 : f32 to vector<8x8xf32>
      %24 = arith.subf %23, %22 : vector<8x8xf32>
      %25 = math.exp %24 : vector<8x8xf32>
      %cst_18 = arith.constant 0.000000e+00 : f32
      %26 = vector.broadcast %cst_18 : f32 to vector<8x8xf32>
      %27 = arith.maximumf %20, %26 : vector<8x8xf32>
      %28 = arith.mulf %20, %21 : vector<8x8xf32>
      %29 = arith.subf %27, %28 : vector<8x8xf32>
      %30 = math.log1p %25 : vector<8x8xf32>
      %31 = arith.addf %29, %30 : vector<8x8xf32>
      %32 = vector.shape_cast %31 : vector<8x8xf32> to vector<1x8x8xf32>
      %cst_19 = arith.constant dense<0.000000e+00> : vector<1xf32>
      %33 = vector.multi_reduction <add>, %32, %cst_19 [1, 2] : vector<1x8x8xf32> to vector<1xf32>
      %34 = vector.shape_cast %33 : vector<1xf32> to vector<1x1x1xf32>
      %35 = vector.extract %34[0, 0, 0] : f32 from vector<1x1x1xf32>
      %cst_20 = arith.constant 6.400000e+01 : f32
      %36 = arith.divf %35, %cst_20 : f32
      %cst_21 = arith.constant 0.000000e+00 : f32
      %37 = vector.broadcast %cst_21 : f32 to vector<8x8xf32>
      %38 = arith.cmpf ogt, %20, %37 : vector<8x8xf32>
      %cst_22 = arith.constant 5.000000e-01 : f32
      %39 = vector.broadcast %cst_22 : f32 to vector<8x8xf32>
      %40 = arith.cmpf ogt, %21, %39 : vector<8x8xf32>
      %41 = arith.xori %38, %40 : vector<8x8xi1>
      %cst_23 = arith.constant dense<true> : vector<8x8xi1>
      %42 = arith.xori %41, %cst_23 : vector<8x8xi1>
      %43 = arith.extui %42 : vector<8x8xi1> to vector<8x8xi32>
      %44 = arith.sitofp %43 : vector<8x8xi32> to vector<8x8xf32>
      %45 = vector.shape_cast %44 : vector<8x8xf32> to vector<1x8x8xf32>
      %cst_24 = arith.constant dense<0.000000e+00> : vector<1xf32>
      %46 = vector.multi_reduction <add>, %45, %cst_24 [1, 2] : vector<1x8x8xf32> to vector<1xf32>
      %47 = vector.shape_cast %46 : vector<1xf32> to vector<1x1x1xf32>
      %48 = vector.extract %47[0, 0, 0] : f32 from vector<1x1x1xf32>
      %cst_25 = arith.constant 6.400000e+01 : f32
      %49 = arith.divf %48, %cst_25 : f32
      %cst_26 = arith.constant 1.000000e+00 : f32
      %50 = vector.broadcast %cst_26 : f32 to vector<8x8xf32>
      %51 = arith.addf %50, %25 : vector<8x8xf32>
      %cst_27 = arith.constant 1.000000e+00 : f32
      %52 = vector.broadcast %cst_27 : f32 to vector<8x8xf32>
      %53 = arith.divf %52, %51 : vector<8x8xf32>
      %cst_28 = arith.constant 0.000000e+00 : f32
      %54 = vector.broadcast %cst_28 : f32 to vector<8x8xf32>
      %55 = arith.cmpf oge, %20, %54 : vector<8x8xf32>
      %56 = arith.mulf %25, %53 : vector<8x8xf32>
      %57 = arith.select %55, %53, %56 : vector<8x8xi1>, vector<8x8xf32>
      %58 = arith.mulf %57, %21 : vector<8x8xf32>
      %cst_29 = arith.constant dense<0.000000e+00> : vector<8xf32>
      %59 = vector.multi_reduction <add>, %58, %cst_29 [0] : vector<8x8xf32> to vector<8xf32>
      %cst_30 = arith.constant 1.000000e+00 : f32
      %60 = vector.broadcast %cst_30 : f32 to vector<8x8xf32>
      %61 = arith.subf %60, %21 : vector<8x8xf32>
      %62 = arith.mulf %57, %61 : vector<8x8xf32>
      %cst_31 = arith.constant dense<0.000000e+00> : vector<8xf32>
      %63 = vector.multi_reduction <add>, %62, %cst_31 [0] : vector<8x8xf32> to vector<8xf32>
      %cst_32 = arith.constant 1.000000e+00 : f32
      %64 = vector.broadcast %cst_32 : f32 to vector<8x8xf32>
      %65 = arith.subf %64, %57 : vector<8x8xf32>
      %66 = arith.mulf %65, %21 : vector<8x8xf32>
      %cst_33 = arith.constant dense<0.000000e+00> : vector<8xf32>
      %67 = vector.multi_reduction <add>, %66, %cst_33 [0] : vector<8x8xf32> to vector<8xf32>
      %cst_34 = arith.constant 2.000000e+00 : f32
      %68 = vector.broadcast %cst_34 : f32 to vector<8xf32>
      %69 = arith.mulf %68, %59 : vector<8xf32>
      %cst_35 = arith.constant 2.000000e+00 : f32
      %70 = vector.broadcast %cst_35 : f32 to vector<8xf32>
      %71 = arith.mulf %70, %59 : vector<8xf32>
      %72 = arith.addf %71, %63 : vector<8xf32>
      %73 = arith.addf %72, %67 : vector<8xf32>
      %cst_36 = arith.constant 9.99999993E-9 : f32
      %74 = vector.broadcast %cst_36 : f32 to vector<8xf32>
      %75 = arith.addf %73, %74 : vector<8xf32>
      %76 = arith.divf %69, %75 : vector<8xf32>
      %77 = vector.shape_cast %76 : vector<8xf32> to vector<1x8xf32>
      %cst_37 = arith.constant dense<0.000000e+00> : vector<1xf32>
      %78 = vector.multi_reduction <add>, %77, %cst_37 [1] : vector<1x8xf32> to vector<1xf32>
      %79 = vector.shape_cast %78 : vector<1xf32> to vector<1x1xf32>
      %80 = vector.extract %79[0, 0] : f32 from vector<1x1xf32>
      %cst_38 = arith.constant 8.000000e+00 : f32
      %81 = arith.divf %80, %cst_38 : f32
      %cst_39 = arith.constant 1.000000e+00 : f32
      %82 = arith.subf %cst_39, %81 : f32
      %83 = tpu.iota {dimensions = array<i32: 2>} : vector<1x8x128xi32>
      %84 = tpu.iota {dimensions = array<i32: 1>} : vector<1x8x128xi32>
      %c0_i32_40 = arith.constant 0 : i32
      %85 = vector.broadcast %c0_i32_40 : i32 to vector<1x8x128xi32>
      %86 = arith.cmpi eq, %84, %85 : vector<1x8x128xi32>
      %c0_i32_41 = arith.constant 0 : i32
      %87 = vector.broadcast %c0_i32_41 : i32 to vector<1x8x128xi32>
      %88 = arith.cmpi eq, %83, %87 : vector<1x8x128xi32>
      %89 = arith.andi %86, %88 : vector<1x8x128xi1>
      %cst_42 = arith.constant 0.000000e+00 : f32
      %90 = vector.broadcast %19 : f32 to vector<1x8x128xf32>
      %91 = vector.broadcast %cst_42 : f32 to vector<1x8x128xf32>
      %92 = arith.select %89, %90, %91 : vector<1x8x128xi1>, vector<1x8x128xf32>
      %c0_i32_43 = arith.constant 0 : i32
      %93 = vector.broadcast %c0_i32_43 : i32 to vector<1x8x128xi32>
      %94 = arith.cmpi eq, %84, %93 : vector<1x8x128xi32>
      %c1_i32 = arith.constant 1 : i32
      %95 = vector.broadcast %c1_i32 : i32 to vector<1x8x128xi32>
      %96 = arith.cmpi eq, %83, %95 : vector<1x8x128xi32>
      %97 = arith.andi %94, %96 : vector<1x8x128xi1>
      %cst_44 = arith.constant 0.000000e+00 : f32
      %98 = vector.broadcast %36 : f32 to vector<1x8x128xf32>
      %99 = vector.broadcast %cst_44 : f32 to vector<1x8x128xf32>
      %100 = arith.select %97, %98, %99 : vector<1x8x128xi1>, vector<1x8x128xf32>
      %101 = arith.addf %92, %100 : vector<1x8x128xf32>
      %c0_i32_45 = arith.constant 0 : i32
      %102 = vector.broadcast %c0_i32_45 : i32 to vector<1x8x128xi32>
      %103 = arith.cmpi eq, %84, %102 : vector<1x8x128xi32>
      %c2_i32 = arith.constant 2 : i32
      %104 = vector.broadcast %c2_i32 : i32 to vector<1x8x128xi32>
      %105 = arith.cmpi eq, %83, %104 : vector<1x8x128xi32>
      %106 = arith.andi %103, %105 : vector<1x8x128xi1>
      %cst_46 = arith.constant 0.000000e+00 : f32
      %107 = vector.broadcast %49 : f32 to vector<1x8x128xf32>
      %108 = vector.broadcast %cst_46 : f32 to vector<1x8x128xf32>
      %109 = arith.select %106, %107, %108 : vector<1x8x128xi1>, vector<1x8x128xf32>
      %110 = arith.addf %101, %109 : vector<1x8x128xf32>
      %c0_i32_47 = arith.constant 0 : i32
      %111 = vector.broadcast %c0_i32_47 : i32 to vector<1x8x128xi32>
      %112 = arith.cmpi eq, %84, %111 : vector<1x8x128xi32>
      %c3_i32 = arith.constant 3 : i32
      %113 = vector.broadcast %c3_i32 : i32 to vector<1x8x128xi32>
      %114 = arith.cmpi eq, %83, %113 : vector<1x8x128xi32>
      %115 = arith.andi %112, %114 : vector<1x8x128xi1>
      %cst_48 = arith.constant 0.000000e+00 : f32
      %116 = vector.broadcast %82 : f32 to vector<1x8x128xf32>
      %117 = vector.broadcast %cst_48 : f32 to vector<1x8x128xf32>
      %118 = arith.select %115, %116, %117 : vector<1x8x128xi1>, vector<1x8x128xf32>
      %119 = arith.addf %110, %118 : vector<1x8x128xf32>
      %c0_49 = arith.constant 0 : index
      %c0_50 = arith.constant 0 : index
      %c0_51 = arith.constant 0 : index
      %120 = vector.load %arg6[%c0_49, %c0_50, %c0_51] : memref<1x8x128xf32, #tpu.memory_space<vmem>>, vector<1x8x128xf32>
      tpu.vector_store %arg6[%c0_49, %c0_50, %c0_51], %119 {strides = array<i32>} : memref<1x8x128xf32, #tpu.memory_space<vmem>>, vector<1x8x128xf32>,
    } else {
    }
    return
  }
  func.func @transform_0(%arg0: i32, %arg1: i32) -> (i32, i32) {
    %c0_i32 = arith.constant 0 : i32
    %c0_i32_0 = arith.constant 0 : i32
    %c0_i32_1 = arith.constant 0 : i32
    return %c0_i32, %c0_i32_0 : i32, i32
  }
  func.func @transform_1(%arg0: i32, %arg1: i32) -> (i32, i32) {
    %c0_i32 = arith.constant 0 : i32
    %c0_i32_0 = arith.constant 0 : i32
    %c0_i32_1 = arith.constant 0 : i32
    return %c0_i32, %c0_i32_0 : i32, i32
  }
  func.func @transform_2(%arg0: i32, %arg1: i32) -> (i32, i32) {
    %c1_i32 = arith.constant 1 : i32
    %0 = arith.muli %arg0, %c1_i32 : i32
    %1 = arith.addi %0, %arg1 : i32
    %c0_i32 = arith.constant 0 : i32
    %2 = arith.minsi %1, %c0_i32 : i32
    %c0_i32_0 = arith.constant 0 : i32
    %c0_i32_1 = arith.constant 0 : i32
    return %2, %c0_i32_0 : i32, i32
  }
  func.func @transform_3(%arg0: i32, %arg1: i32) -> (i32, i32) {
    %c1_i32 = arith.constant 1 : i32
    %0 = arith.muli %arg0, %c1_i32 : i32
    %1 = arith.addi %0, %arg1 : i32
    %c0_i32 = arith.constant 0 : i32
    %2 = arith.minsi %1, %c0_i32 : i32
    %c0_i32_0 = arith.constant 0 : i32
    %c0_i32_1 = arith.constant 0 : i32
    return %2, %c0_i32_0 : i32, i32
  }
  func.func @transform_4(%arg0: i32, %arg1: i32) -> (i32, i32, i32) {
    %c0_i32 = arith.constant 0 : i32
    %c0_i32_0 = arith.constant 0 : i32
    %c0_i32_1 = arith.constant 0 : i32
    return %arg0, %c0_i32, %c0_i32_0 : i32, i32, i32
  }
}

</mosaic_0001>

<bundles_post_ra>
// kernel: tpu_custom_call.1
= control target key start
LH: loop header
LB: loop body
LE: loop exit
PB: predicated region body
PF: predicated region fallthrough
CT: control target
= control target key end

     0   :  { %9 = vsyncpa [#allocation4], 0  ;;  %s511_s0 = inlined_call_operand.hbm [shape: f32[8,8], index: 0, kind: input, shape index: {}]   ;;  %s512_s1 = inlined_call_operand.hbm [shape: f32[8,8], index: 1, kind: input, shape index: {}]   ;;  %s513_s2 = inlined_call_operand.hbm [shape: f32[16,128], index: 2, kind: input, shape index: {}]   ;;  %s514_s3 = inlined_call_operand.hbm [shape: f32[16,128], index: 3, kind: input, shape index: {}]   ;;  %s515_s4 = inlined_call_operand.hbm [shape: f32[1,8,128], index: 4, kind: output, shape index: {}]  }
   0x1   :  { %10 = vsyncpa [#allocation7], 0 }
   0x2   :  { %11 = vsyncpa [#allocation10], 0 }
   0x3   :  { %12 = vsyncpa [#allocation5], 0  ;;  %s407_s15 = smov [#allocation6]   ;;  %s408_s17 = smov [#allocation3]  }
   0x4   :  { %s29_s16 = sshll.u32 %s407_s15, 4  ;;  %s19_s18 = sshll.u32 %s408_s17, 4  ;;  %s30_s16 = int_to_ptr.vmem [resolvable:$true] %s29_s16  ;;  %s20_s18 = int_to_ptr.vmem [resolvable:$true] %s19_s18 }
   0x5   :  { %s289_s21 = scalar_lea.hbm %s512_s1, 128 }
   0x6   :  { %p290_p0 = scmp.ne.s32.totalorder %s512_s1, %s289_s21  ;;  %p293_p1 = scmp.lt.u32.totalorder %s289_s21, %s512_s1 }
   0x8   :  { %p295_p2 = pnand %p293_p1, %p290_p0 }
   0xa   :  { %298 = shalt.err (!%p295_p2)
}
   0xb   :  { %s299_s26 = scalar_lea.vmem %s30_s16, 128  ;;  %p304_p4 = scmp.lt.s32.totalorder %s30_s16, %s30_s16 }
   0xc   :  { %p300_p3 = scmp.ne.s32.totalorder %s30_s16, %s299_s26  ;;  %p305_p5 = scmp.lt.s32.totalorder %s299_s26, %s299_s26 }
   0xe   :  { %p306_p6 = por %p305_p5, %p304_p4 }
  0x10   :  { %p307_p7 = pnand %p306_p6, %p300_p3 }
  0x12   :  { %310 = shalt.err (!%p307_p7)
}
  0x13   :  { %32 = dma.hbm_to_vmem [thread:$0]  %s512_s1, 128, %s30_s16, [#allocation7]  }
  0x14   :  { %s311_s5 = scalar_lea.hbm %s511_s0, 128 }
  0x15   :  { %p312_p8 = scmp.ne.s32.totalorder %s511_s0, %s311_s5  ;;  %p315_p9 = scmp.lt.u32.totalorder %s311_s5, %s511_s0 }
  0x17   :  { %p317_p10 = pnand %p315_p9, %p312_p8 }
  0x19   :  { %320 = shalt.err (!%p317_p10)
}
  0x1a   :  { %s321_s10 = scalar_lea.vmem %s20_s18, 128  ;;  %p326_p12 = scmp.lt.s32.totalorder %s20_s18, %s20_s18 }
  0x1b   :  { %p322_p11 = scmp.ne.s32.totalorder %s20_s18, %s321_s10  ;;  %p327_p13 = scmp.lt.s32.totalorder %s321_s10, %s321_s10 }
  0x1d   :  { %p328_p0 = por %p327_p13, %p326_p12 }
  0x1f   :  { %p329_p1 = pnand %p328_p0, %p322_p11 }
  0x21   :  { %332 = shalt.err (!%p329_p1)
}
  0x22   :  { %22 = dma.hbm_to_vmem [thread:$0]  %s511_s0, 128, %s20_s18, [#allocation4]  }
  0x23   :  { %s409_s12 = smov [#allocation8]   ;;  %s333_s16 = scalar_lea.hbm %s513_s2, 256 }
  0x24   :  { %s44_s13 = sshll.u32 %s409_s12, 4  ;;  %p334_p2 = scmp.ne.s32.totalorder %s513_s2, %s333_s16  ;;  %s45_s13 = int_to_ptr.vmem [resolvable:$true] %s44_s13 }
  0x25   :  { %p337_p3 = scmp.lt.u32.totalorder %s333_s16, %s513_s2 }
  0x27   :  { %p339_p4 = pnand %p337_p3, %p334_p2 }
  0x29   :  { %342 = shalt.err (!%p339_p4)
}
  0x2a   :  { %s343_s22 = scalar_lea.vmem %s45_s13, 256  ;;  %p348_p6 = scmp.lt.s32.totalorder %s45_s13, %s45_s13 }
  0x2b   :  { %p344_p5 = scmp.ne.s32.totalorder %s45_s13, %s343_s22  ;;  %p349_p7 = scmp.lt.s32.totalorder %s343_s22, %s343_s22 }
  0x2d   :  { %p350_p8 = por %p349_p7, %p348_p6 }
  0x2f   :  { %p351_p9 = pnand %p350_p8, %p344_p5 }
  0x31   :  { %354 = shalt.err (!%p351_p9)
}
  0x32   :  { %s410_s0 = smov 128   ;;  %s411_s18 = smov 8  }
  0x33   :  { %50 = dma.hbm_to_vmem [thread:$0]  %s513_s2, 256, %s45_s13, [#allocation7], %s410_s0, %s410_s0, %s411_s18  }
  0x34   :  { %s412_s25 = smov [#allocation9]   ;;  %s355_s29 = scalar_lea.hbm %s514_s3, 256 }
  0x35   :  { %s62_s26 = sshll.u32 %s412_s25, 4  ;;  %p356_p10 = scmp.ne.s32.totalorder %s514_s3, %s355_s29  ;;  %s63_s26 = int_to_ptr.vmem [resolvable:$true] %s62_s26 }
  0x36   :  { %p359_p11 = scmp.lt.u32.totalorder %s355_s29, %s514_s3 }
  0x38   :  { %p361_p12 = pnand %p359_p11, %p356_p10 }
  0x3a   :  { %364 = shalt.err (!%p361_p12)
}
  0x3b   :  { %s365_s8 = scalar_lea.vmem %s63_s26, 256  ;;  %p370_p0 = scmp.lt.s32.totalorder %s63_s26, %s63_s26 }
  0x3c   :  { %p366_p13 = scmp.ne.s32.totalorder %s63_s26, %s365_s8  ;;  %p371_p1 = scmp.lt.s32.totalorder %s365_s8, %s365_s8 }
  0x3e   :  { %p372_p2 = por %p371_p1, %p370_p0 }
  0x40   :  { %p373_p3 = pnand %p372_p2, %p366_p13 }
  0x42   :  { %376 = shalt.err (!%p373_p3)
}
  0x43   :  { %68 = dma.hbm_to_vmem [thread:$0]  %s514_s3, 256, %s63_s26, [#allocation10], %s410_s0, %s410_s0, %s411_s18  }
  0x44   :  { %399 = dma.done.wait [#allocation4], 128  }
  0x45   :  { %400 = vsyncadd [#allocation4], 4294967168 }
  0x46   :  { %401 = dma.done.wait [#allocation7], 384  }
  0x47   :  { %402 = vsyncadd [#allocation7], 4294966912 }
  0x48   :  { %403 = dma.done.wait [#allocation10], 256  }
  0x49   :  { %404 = vsyncadd [#allocation10], 4294967040  ;;  %v94_v0 = vld [vmem:[#allocation8] sm:$0xff]  ;;  %v95_v1 = vld [vmem:[#allocation8 + $0x8] sm:$0xff]  ;;  %vm413_vm3 = vmmov 1   ;;  %vm138_vm5 = vcmask 64512  }
  0x4a   :  { %v96_v2 = vld [vmem:[#allocation9] sm:$0xff]  ;;  %v97_v3 = vld [vmem:[#allocation9 + $0x8] sm:$0xff]  ;;  %v414_v14 = vmov 0.0   ;;  %s415_s16 = smov [#allocation11]  }
  0x4b   :  { %v98_v4 = vsub.f32 %v94_v0, %v96_v2  ;;  %v119_v5 = vld [vmem:[#allocation3] sm:$0xff]  ;;  %v99_v6 = vsub.f32 %v95_v1, %v97_v3  ;;  %v120_v7 = vld [vmem:[#allocation6] sm:$0xff]  ;;  %s248_s17 = sshll.u32 %s415_s16, 4  ;;  %s249_s17 = int_to_ptr.vmem [resolvable:$true] %s248_s17 }
  0x4c   :  { %v121_v8 = vand.u32 2147483647, %v119_v5  ;;  %vm152_vm0 = vcmp.gt.f32.partialorder %v119_v5, 0.0  ;;  %vm153_vm1 = vcmp.gt.f32.partialorder %v120_v7, 0.5  ;;  %v125_v21 = vmax.f32 %v119_v5, 0.0  ;;  %s377_s19 = scalar_lea.vmem %s249_s17, 128  ;;  %p382_p5 = scmp.lt.s32.totalorder %s249_s17, %s249_s17 }
  0x4d   :  { %v100_v9 = vmul.f32 %v98_v4, %v98_v4  ;;  %v101_v10 = vmul.f32 %v99_v6, %v99_v6  ;;  %vm154_vm2 = vmxor %vm152_vm0, %vm153_vm1  ;;  %v126_v22 = vmul.f32 %v120_v7, %v119_v5  ;;  %vm174_vm7 = vcmp.ge.f32.partialorder %v119_v5, 0.0  ;;  %p378_p4 = scmp.ne.s32.totalorder %s249_s17, %s377_s19  ;;  %p383_p6 = scmp.lt.s32.totalorder %s377_s19, %s377_s19 }
  0x4e   :  { %v122_v11 = vsub.f32 0.0, %v121_v8  ;;  %vm155_vm4 = vmxor %vm154_vm2, %vm413_vm3  ;;  %v185_v29 = vsub.f32 1.0, %v120_v7 }
  0x4f   :  { %v103_v12 = vadd.f32 %v101_v10, %v100_v9  ;;  %v263_v15 = vsel %vm155_vm4, 1.0, %v414_v14  ;;  %v127_v26 = vsub.f32 %v125_v21, %v126_v22  ;;  %p384_p7 = por %p383_p6, %p382_p5 }
  0x50   :  { %v123_v13 = vmul.f32 1.442695, %v122_v11  ;;  %v158_v16 = vsel %vm138_vm5, %v263_v15, 0.0 }
  0x51   :  { %110 = vadd.xlane.f32.xlu0 %v103_v12  ;;  %159 = vadd.xlane.f32.xlu1 %v158_v16  ;;  %p385_p8 = pnand %p384_p7, %p378_p4 }
  0x52   :  { %281 = vpow2.f32 %v123_v13 }
  0x5c   :  { %v282_v17 = vpop.eup %281 }
  0x5d   :  { %v128_v18 = vadd.f32 1.0, %v282_v17  ;;  %v131_v19 = vmul.f32 -0.5, %v282_v17  ;;  %v134_v23 = vand.u32 2147483647, %v282_v17 }
  0x5f   :  { %283 = vlog2.f32 %v128_v18  ;;  %v132_v20 = vadd.f32 1.0, %v131_v19  ;;  %vm135_vm6 = vcmp.lt.f32.partialorder %v134_v23, 0.0004427343 }
  0x60   :  { %285 = vrcp.f32 %v128_v18 }
  0x61   :  { %v133_v24 = vmul.f32 %v282_v17, %v132_v20 }
  0x69   :  { %v284_v25 = vpop.eup %283 }
  0x6a   :  { %v286_v27 = vpop.eup %285  ;;  %v130_v28 = vmul.f32 0.6931472, %v284_v25  ;;  %v217_v25 = vlaneseq }
  0x6b   :  { %v175_v30 = vmul.f32 %v286_v27, %v282_v17 }
  0x6c   :  { %v136_v31 = vsel %vm135_vm6, %v133_v24, %v130_v28 }
  0x6d   :  { %v137_v32 = vadd.f32 %v136_v31, %v127_v26  ;;  %v176_v33 = vsel %vm174_vm7, %v286_v27, %v175_v30  ;;  %v218_v26 = vand.u32 127, %v217_v25  ;;  %v220_v27 = vshrl.u32 %v217_v25, 7 }
  0x6e   :  { %v177_v34 = vmul.f32 %v176_v33, %v120_v7  ;;  %v186_v35 = vmul.f32 %v185_v29, %v176_v33  ;;  %v194_v36 = vsub.f32 1.0, %v176_v33 }
  0x6f   :  { %v139_v37 = vsel %vm138_vm5, %v137_v32, 0.0  ;;  %vm221_vm8 = vcmp.eq.s32.totalorder %v220_v27, 0  ;;  %vm222_vm9 = vcmp.eq.s32.totalorder %v218_v26, 0  ;;  %vm226_vm10 = vcmp.eq.s32.totalorder %v218_v26, 1 }
  0x70   :  { %140 = vadd.xlane.f32.xlu0 %v139_v37  ;;  %v178_v38 = vsel %vm138_vm5, %v177_v34, 0.0  ;;  %v187_v39 = vsel %vm138_vm5, %v186_v35, 0.0  ;;  %v195_v40 = vmul.f32 %v194_v36, %v120_v7  ;;  %vm223_vm11 = vmand %vm221_vm8, %vm222_vm9  ;;  %vm231_vm13 = vcmp.eq.s32.totalorder %v218_v26, 2 }
  0x71   :  { %v179_v41 = vrot.slane %v178_v38, 4  ;;  %v188_v42 = vrot.slane %v187_v39, 4  ;;  %vm227_vm12 = vmand %vm221_vm8, %vm226_vm10  ;;  %vm236_vm15 = vcmp.eq.s32.totalorder %v218_v26, 3 }
  0x72   :  { %v196_v43 = vsel %vm138_vm5, %v195_v40, 0.0  ;;  %vm232_vm14 = vmand %vm221_vm8, %vm231_vm13 }
  0x73   :  { %v180_v44 = vadd.f32 %v179_v41, %v178_v38  ;;  %v189_v45 = vadd.f32 %v188_v42, %v187_v39  ;;  %v197_v46 = vrot.slane %v196_v43, 4  ;;  %vm237_vm0 = vmand %vm221_vm8, %vm236_vm15 }
  0x75   :  { %v181_v47 = vrot.slane %v180_v44, 2  ;;  %v190_v48 = vrot.slane %v189_v45, 2  ;;  %v198_v49 = vadd.f32 %v197_v46, %v196_v43 }
  0x77   :  { %v182_v50 = vadd.f32 %v181_v47, %v180_v44  ;;  %v191_v51 = vadd.f32 %v190_v48, %v189_v45  ;;  %v199_v52 = vrot.slane %v198_v49, 2 }
  0x79   :  { %v183_v53 = vrot.slane %v182_v50, 1  ;;  %v192_v54 = vrot.slane %v191_v51, 1  ;;  %v200_v55 = vadd.f32 %v199_v52, %v198_v49 }
  0x7b   :  { %v184_v56 = vadd.f32 %v183_v53, %v182_v50  ;;  %v193_v57 = vadd.f32 %v192_v54, %v191_v51  ;;  %v201_v58 = vrot.slane %v200_v55, 1 }
  0x7d   :  { %v202_v59 = vadd.f32 %v201_v58, %v200_v55  ;;  %v203_v60 = vmul.f32 2.0, %v184_v56 }
  0x7f   :  { %v204_v61 = vadd.f32 %v203_v60, %v193_v57 }
  0x81   :  { %v205_v62 = vadd.f32 %v204_v61, %v202_v59 }
  0x83   :  { %v206_v63 = vadd.f32 1e-08, %v205_v62 }
  0x85   :  { %287 = vrcp.f32 %v206_v63 }
  0x8f   :  { %v288_v0 = vpop.eup %287 }
  0x90   :  { %v208_v1 = vmul.f32 %v288_v0, %v203_v60 }
  0x92   :  { %v209_v2 = vsel %vm138_vm5, %v208_v1, 0.0 }
  0x93   :  { %210 = vadd.xlane.f32.xlu1 %v209_v2 }
  0xde   :  { %v111_v3 = vpop.xlane.xlu0 %110  ;;  %v160_v10 = vpop.xlane.xlu1 %159 }
  0xdf   :  { %v112_v4 = vrot.slane %v111_v3, 4  ;;  %v161_v11 = vrot.slane %v160_v10, 4 }
  0xe1   :  { %v113_v5 = vadd.f32 %v112_v4, %v111_v3  ;;  %v162_v12 = vadd.f32 %v161_v11, %v160_v10 }
  0xe3   :  { %v114_v6 = vrot.slane %v113_v5, 2  ;;  %v163_v13 = vrot.slane %v162_v12, 2 }
  0xe5   :  { %v115_v7 = vadd.f32 %v114_v6, %v113_v5  ;;  %v164_v16 = vadd.f32 %v163_v13, %v162_v12 }
  0xe7   :  { %v116_v8 = vrot.slane %v115_v7, 1  ;;  %v165_v19 = vrot.slane %v164_v16, 1 }
  0xe9   :  { %v117_v9 = vadd.f32 %v116_v8, %v115_v7  ;;  %v166_v22 = vadd.f32 %v165_v19, %v164_v16 }
  0xeb   :  { %264 = vpush %v117_v9 }
  0xfd   :  { %v141_v14 = vpop.xlane.xlu0 %140 }
  0xfe   :  { %v142_v15 = vrot.slane %v141_v14, 4 }
 0x100   :  { %v143_v17 = vadd.f32 %v142_v15, %v141_v14 }
 0x102   :  { %v144_v18 = vrot.slane %v143_v17, 2 }
 0x104   :  { %v145_v20 = vadd.f32 %v144_v18, %v143_v17 }
 0x106   :  { %v146_v21 = vrot.slane %v145_v20, 1 }
 0x108   :  { %v147_v23 = vadd.f32 %v146_v21, %v145_v20 }
 0x10a   :  { %266 = vpush %v147_v23 }
 0x10b   :  { %268 = vpush %v166_v22 }
 0x11c   :  { %s265_s3 = spop %264 }
 0x11d   :  { %v224_v28 = vstv %s265_s3 }
 0x11e   :  { %v225_v30 = vsel %vm223_vm11, %v224_v28, 0.0 }
 0x120   :  { %v211_v24 = vpop.xlane.xlu1 %210 }
 0x121   :  { %270 = vpush %v211_v24 }
 0x13b   :  { %s267_s10 = spop %266 }
 0x13c   :  { %s151_s1 = smul.f32 0.015625, %s267_s10  ;;  %s269_s11 = spop %268 }
 0x13d   :  { %s170_s12 = smul.f32 0.015625, %s269_s11 }
 0x13e   :  { %v228_v29 = vstv %s151_s1 }
 0x13f   :  { %v229_v31 = vsel %vm227_vm12, %v228_v29, 0.0  ;;  %v233_v32 = vstv %s170_s12 }
 0x140   :  { %v230_v33 = vadd.f32 %v229_v31, %v225_v30  ;;  %v234_v34 = vsel %vm232_vm14, %v233_v32, 0.0 }
 0x142   :  { %v235_v35 = vadd.f32 %v234_v34, %v230_v33 }
 0x152   :  { %s271_s13 = spop %270 }
 0x153   :  { %s215_s14 = smul.f32 0.125, %s271_s13 }
 0x155   :  { %s216_s15 = ssub.f32 1.0, %s215_s14 }
 0x157   :  { %v238_v36 = vstv %s216_s15 }
 0x158   :  { %v239_v37 = vsel %vm237_vm0, %v238_v36, 0.0 }
 0x159   :  { %v240_v38 = vadd.f32 %v239_v37, %v235_v35 }
 0x15b   :  { %241 = vst [vmem:[#allocation11] sm:$0xff] %v240_v38 }
 0x15c   :  { %388 = shalt.err (!%p385_p8)
}
 0x15d   :  { %s389_s22 = scalar_lea.hbm %s515_s4, 128 }
 0x15e   :  { %p390_p9 = scmp.ne.s32.totalorder %s515_s4, %s389_s22  ;;  %p393_p10 = scmp.lt.u32.totalorder %s389_s22, %s515_s4 }
 0x160   :  { %p395_p11 = pnand %p393_p10, %p390_p9 }
 0x162   :  { %398 = shalt.err (!%p395_p11)
}
 0x163   :  { %251 = dma.vmem_to_hbm [thread:$0]  %s249_s17, 128, %s515_s4, [#allocation5]  }
 0x164   :  { %405 = dma.done.wait [#allocation5], 128  }
 0x165   :  { %406 = vsyncadd [#allocation5], 4294967168 }
 0x166   :  { %255 = vsyncpa [#allocation4], 1 }
 0x167   :  { %256 = vsyncpa [#allocation7], 1 }
 0x168   :  { %257 = vsyncpa [#allocation10], 1 }
 0x169   :  { %258 = vsyncpa [#allocation5], 1 }

</bundles_post_ra>
